<compile_context>
chip_gen: v6e
topology: v6e:2x2x1
jax: 0.10.0
libtpu: 0.0.40
codegen_flags: <defaults>
</compile_context>

<pallas_src>
import numpy as np
import jax
import jax.numpy as jnp
from jax.experimental import pallas as pl
from jax.experimental.pallas import tpu as pltpu

EPS = 1e-5
DILS = (1, 2, 3)

# Operand dtype for the big branch matmul (slab + block-structured weight).
# bf16 operands + f32 accumulation: ~2x MXU throughput on v6e/v7x and half the
# tap / scratch traffic.  All BatchNorm statistics and scale/shift math is f32.
MXU_DTYPE = jnp.bfloat16

# Scoped-VMEM limit handed to Mosaic (well above the per-tile footprint, below
# v7x's 64 MiB physical VMEM; raises v5e's 16 MiB default).
VMEM_LIMIT = 32 * 1024 * 1024


def _round_up(v, m):
    return -(-v // m) * m


# --------------------------- in-kernel helpers ------------------------------ #

def _tile_stats(h, tile_rows):
    """Per-tile Welford-style partial stats: row0 = sum, row1 = M2 about the
    tile mean.  Merged exactly across tiles in the wrapper."""
    tsum = jnp.sum(h, axis=0, keepdims=True)
    dm = h - tsum * (1.0 / tile_rows)
    tm2 = jnp.sum(dm * dm, axis=0, keepdims=True)
    return jnp.concatenate([tsum, tm2], axis=0)[None]          # (1, 2, C)


# ------------------------------ pass 1 kernel ------------------------------- #
# Per-tile statistics of the stem  ReLU(x @ W1 + b1)  (all four 1x1 convs fused).

def _make_pass1_kernel(tile_rows):
    def kernel(x_ref, w1_ref, b1_ref, st_ref):
        h = jnp.dot(x_ref[...], w1_ref[...], preferred_element_type=jnp.float32)
        h = jnp.maximum(h + b1_ref[...], 0.0)
        st_ref[...] = _tile_stats(h, tile_rows)
    return kernel


# ------------------------------ pass 2 kernel ------------------------------- #
# Recompute + normalize the stem over a halo window, build the 27-tap dilated
# slab with in-kernel padding masks, ONE block-structured MXU matmul for all
# three branches, ReLU, per-tile branch stats, write pre-BN branch activations.

def _make_pass2_kernel(H, W, tile_rows, halo):
    def kernel(xa_ref, xb_ref, w1_ref, b1_ref, ss_ref, sh_ref,
               w3_ref, b3_ref, hb_ref, st_ref, stem_scr):
        i = pl.program_id(0)

        # --- recompute stem over rows [i*T - halo, i*T + T + halo) and apply
        #     the (already reduced) stem BatchNorm as a scale/shift -----------
        xwin = jnp.concatenate([xa_ref[...], xb_ref[0:2 * halo, :]], axis=0)
        h = jnp.dot(xwin, w1_ref[...], preferred_element_type=jnp.float32)
        h = jnp.maximum(h + b1_ref[...], 0.0)
        stem_scr[...] = (h * ss_ref[...] + sh_ref[...]).astype(stem_scr.dtype)

        # --- in-kernel 'same'-padding masks from the global row index --------
        rows = jax.lax.broadcasted_iota(jnp.int32, (tile_rows, 1), 0) + i * tile_rows
        wcol = rows % W
        hrow = (rows // W) % H

        # --- 27 full-width row-shifted taps -> one (T, 27*4n1) slab ----------
        taps = []
        for d in DILS:
            for ky in range(3):
                for kx in range(3):
                    dy, dx = (ky - 1) * d, (kx - 1) * d
                    s = dy * W + dx                      # static row shift
                    tap = stem_scr[halo + s: halo + s + tile_rows, :]
                    if dy != 0 or dx != 0:
                        ok = ((hrow + dy >= 0) & (hrow + dy < H) &
                              (wcol + dx >= 0) & (wcol + dx < W))
                        tap = jnp.where(ok, tap, jnp.zeros((), tap.dtype))
                    taps.append(tap)
        slab = jnp.concatenate(taps, axis=1)             # (T, 27*4n1), bf16

        # one block-structured MXU matmul: result is lane-dense in concat order
        hb = jnp.dot(slab, w3_ref[...], preferred_element_type=jnp.float32)
        hb = jnp.maximum(hb + b3_ref[...], 0.0)
        hb_ref[...] = hb
        st_ref[...] = _tile_stats(hb, tile_rows)
    return kernel


# ------------------------------ pass 3 kernel ------------------------------- #
# Apply the branch BatchNorm, recompute the tiny conv0 path, assemble output.

def _make_pass3_kernel(n1):
    def kernel(x_ref, hb_ref, w10_ref, b10_ref, ss0_ref, sh0_ref,
               sb_ref, shb_ref, o_ref):
        h0 = jnp.dot(x_ref[...], w10_ref[...], preferred_element_type=jnp.float32)
        h0 = jnp.maximum(h0 + b10_ref[...], 0.0)
        # two direct sub-range stores instead of a lane concatenate
        o_ref[:, 0:n1] = (h0 * ss0_ref[...] + sh0_ref[...]).astype(o_ref.dtype)
        o_ref[:, n1:] = (hb_ref[...] * sb_ref[...] + shb_ref[...]).astype(o_ref.dtype)
    return kernel


# ------------------------------ wrapper glue -------------------------------- #

def _pick_tile_rows(P, halo, target=1024):
    """Largest multiple-of-8 divisor of P that is <= target and >= 2*halo."""
    cands = [t for t in range(8, P + 1, 8) if P % t == 0 and t >= 2 * halo]
    assert cands, f"P={P} too small / not padded for halo={halo}"
    under = [t for t in cands if t <= target]
    return max(under) if under else min(cands)


def _merge_stats(stats, tile_rows, total):
    """Exact cross-tile merge of per-tile (sum, M2) -> (mean, biased var)."""
    tsum = stats[:, 0, :]
    tm2 = stats[:, 1, :]
    mean = jnp.sum(tsum, axis=0) / total
    tmean = tsum / tile_rows
    m2 = jnp.sum(tm2, axis=0) + tile_rows * jnp.sum(jnp.square(tmean - mean), axis=0)
    return mean, m2 / total


def _bn_scale_shift(mean, var, gamma, beta):
    scale = gamma * jax.lax.rsqrt(var + EPS)
    shift = beta - mean * scale
    return scale, shift                                   # (1, C)


def _assemble_block_weight(branches, n1):
    """(27*4*n1, n3+n5+n7) weight, zero outside each branch's (tap, channel)
    block, so all three dilated 3x3 convs become ONE MXU matmul whose result is
    already in output-concat order.  Slab columns: for d in (1,2,3), for tap
    k in 0..8, the full 4*n1 stem channels; branch bi only reads stem channels
    [(bi+1)*n1, (bi+2)*n1) of its own 9 taps."""
    C4 = 4 * n1
    nouts = [w.shape[-1] for (w, _, _, _) in branches]
    w3 = np.zeros((27 * C4, int(sum(nouts))), np.float32)
    col = 0
    for bi, (w, _, _, _) in enumerate(branches):
        w_np = np.asarray(w, np.float32)                    # (9, n1, nout)
        nout = w_np.shape[-1]
        for k in range(9):
            r0 = (bi * 9 + k) * C4 + (bi + 1) * n1
            w3[r0:r0 + n1, col:col + nout] = w_np[k]
        col += nout
    return jnp.asarray(w3)


def dilated_inception_forward(x_nchw, params, tile_rows=None):
    N, Cin, H, W = x_nchw.shape
    P = N * H * W
    n1 = params["n1"]
    nouts = tuple(w.shape[-1] for (w, _, _, _) in params["br"])
    nb = sum(nouts)
    Cout = n1 + nb
    C4 = 4 * n1

    halo = _round_up(max(DILS) * (W + 1), 8)               # max |row shift|, 8-aligned
    tile = tile_rows if tile_rows is not None else _pick_tile_rows(P, halo)
    assert P % tile == 0 and tile % 8 == 0 and tile >= 2 * halo, (P, tile, halo)
    n_tiles = P // tile

    # ---- glue: NCHW -> flattened (P, C) rows; halo-padded copy for pass 2 ----
    x2d = jnp.transpose(x_nchw, (0, 2, 3, 1)).reshape(P, Cin).astype(jnp.float32)
    x_pad = jnp.pad(x2d, ((halo, tile - halo), (0, 0)))     # (n_tiles+1)*tile rows

    # ---- parameters (host-side prep, pure glue) ----
    w1 = params["w1"]                                        # (Cin, 4*n1) f32
    b1, g1, be1 = params["b1"], params["g1"], params["be1"]  # (1, 4*n1) f32
    b3 = jnp.concatenate([b for (_, b, _, _) in params["br"]], axis=1)
    g3 = jnp.concatenate([g for (_, _, g, _) in params["br"]], axis=1)
    be3 = jnp.concatenate([be for (_, _, _, be) in params["br"]], axis=1)
    w3blk = _assemble_block_weight(params["br"], n1).astype(MXU_DTYPE)

    cparams = pltpu.CompilerParams(dimension_semantics=("parallel",),
                                   vmem_limit_bytes=VMEM_LIMIT)

    # ---------------- pass 1: per-tile stem statistics ----------------------
    stats1 = pl.pallas_call(
        _make_pass1_kernel(tile),
        grid=(n_tiles,),
        out_shape=jax.ShapeDtypeStruct((n_tiles, 2, C4), jnp.float32),
        in_specs=[pl.BlockSpec((tile, Cin), lambda i: (i, 0)),
                  pl.BlockSpec((Cin, C4), lambda i: (0, 0)),
                  pl.BlockSpec((1, C4), lambda i: (0, 0))],
        out_specs=pl.BlockSpec((1, 2, C4), lambda i: (i, 0, 0)),
        compiler_params=cparams,
    )(x2d, w1, b1)

    mean1, var1 = _merge_stats(stats1, tile, P)
    scale1, shift1 = _bn_scale_shift(mean1, var1, g1, be1)

    # ---------------- pass 2: dilated branches (pre-BN) ---------------------
    K_all = 27 * C4
    cost2 = pl.CostEstimate(
        flops=2 * P * (Cin * C4 + K_all * nb),
        transcendentals=0,
        bytes_accessed=int(2 * (P + tile) * Cin * 4 + P * nb * 4 + K_all * nb * 2))
    hb, stats2 = pl.pallas_call(
        _make_pass2_kernel(H, W, tile, halo),
        grid=(n_tiles,),
        out_shape=(jax.ShapeDtypeStruct((P, nb), jnp.float32),
                   jax.ShapeDtypeStruct((n_tiles, 2, nb), jnp.float32)),
        in_specs=[pl.BlockSpec((tile, Cin), lambda i: (i, 0)),       # window lo
                  pl.BlockSpec((tile, Cin), lambda i: (i + 1, 0)),   # window hi
                  pl.BlockSpec((Cin, C4), lambda i: (0, 0)),         # w1
                  pl.BlockSpec((1, C4), lambda i: (0, 0)),           # b1
                  pl.BlockSpec((1, C4), lambda i: (0, 0)),           # stem BN scale
                  pl.BlockSpec((1, C4), lambda i: (0, 0)),           # stem BN shift
                  pl.BlockSpec((K_all, nb), lambda i: (0, 0)),       # block weight
                  pl.BlockSpec((1, nb), lambda i: (0, 0))],          # b3
        out_specs=(pl.BlockSpec((tile, nb), lambda i: (i, 0)),
                   pl.BlockSpec((1, 2, nb), lambda i: (i, 0, 0))),
        scratch_shapes=[pltpu.VMEM((tile + 2 * halo, C4), MXU_DTYPE)],
        compiler_params=cparams,
        cost_estimate=cost2,
    )(x_pad, x_pad, w1, b1, scale1, shift1, w3blk, b3)

    mean2, var2 = _merge_stats(stats2, tile, P)
    scale2, shift2 = _bn_scale_shift(mean2, var2, g3, be3)

    # ---------------- pass 3: branch BN + conv0, assemble output ------------
    out2d = pl.pallas_call(
        _make_pass3_kernel(n1),
        grid=(n_tiles,),
        out_shape=jax.ShapeDtypeStruct((P, Cout), jnp.float32),
        in_specs=[pl.BlockSpec((tile, Cin), lambda i: (i, 0)),
                  pl.BlockSpec((tile, nb), lambda i: (i, 0)),
                  pl.BlockSpec((Cin, n1), lambda i: (0, 0)),
                  pl.BlockSpec((1, n1), lambda i: (0, 0)),
                  pl.BlockSpec((1, n1), lambda i: (0, 0)),
                  pl.BlockSpec((1, n1), lambda i: (0, 0)),
                  pl.BlockSpec((1, nb), lambda i: (0, 0)),
                  pl.BlockSpec((1, nb), lambda i: (0, 0))],
        out_specs=pl.BlockSpec((tile, Cout), lambda i: (i, 0)),
        compiler_params=cparams,
    )(x2d, hb, w1[:, :n1], b1[:, :n1], scale1[:, :n1], shift1[:, :n1],
      scale2, shift2)

    out = jnp.transpose(out2d.reshape(N, H, W, Cout), (0, 3, 1, 2))
    res = out     # downsample=None -> out_conv = nn.Identity()
    return res, out


# ---------------------------- deterministic params -------------------------- #

def make_params(Cin, n1, n3, n5, n7):
    key = jax.random.PRNGKey(0)
    ks = iter(jax.random.split(key, 32))

    def nrm(shape, scale=0.2):
        return (scale * jax.random.normal(next(ks), shape)).astype(jnp.float32)

    params = {"n1": n1}
    # 1x1 conv weights of the four branches concatenated on the output channel.
    params["w1"] = nrm((Cin, 4 * n1))          # (Cin, Cout) == torch (Cout,Cin,1,1).T
    params["b1"] = nrm((1, 4 * n1))
    params["g1"] = (1.0 + nrm((1, 4 * n1), 0.1)).astype(jnp.float32)
    params["be1"] = nrm((1, 4 * n1), 0.1)
    params["br"] = []
    for nout in (n3, n5, n7):
        params["br"].append((
            nrm((9, n1, nout)),                # (ky*3+kx, Cin, Cout)
            nrm((1, nout)),
            (1.0 + nrm((1, nout), 0.1)).astype(jnp.float32),
            nrm((1, nout), 0.1),
        ))
    return params


# ------------------------------ pure-JAX reference -------------------------- #

def ref_forward(x, params):
    n1 = params["n1"]

    def bn(h, g, b):
        m = h.mean(axis=(0, 2, 3), keepdims=True)
        v = jnp.square(h - m).mean(axis=(0, 2, 3), keepdims=True)
        return ((h - m) * jax.lax.rsqrt(v + EPS) * g[None, :, None, None]
                + b[None, :, None, None])

    stems = []
    for i in range(4):
        w = params["w1"][:, i * n1:(i + 1) * n1]
        b = params["b1"][0, i * n1:(i + 1) * n1]
        g = params["g1"][0, i * n1:(i + 1) * n1]
        be = params["be1"][0, i * n1:(i + 1) * n1]
        h = jnp.einsum("nchw,co->nohw", x, w) + b[None, :, None, None]
        stems.append(bn(jnp.maximum(h, 0.0), g, be))

    outs = [stems[0]]
    for bi, d in enumerate(DILS):
        w3, b3, g3, be3 = params["br"][bi]
        nout = w3.shape[-1]
        w_oihw = jnp.transpose(w3.reshape(3, 3, n1, nout), (3, 2, 0, 1))
        h = jax.lax.conv_general_dilated(
            stems[bi + 1], w_oihw, window_strides=(1, 1), padding="SAME",
            rhs_dilation=(d, d), dimension_numbers=("NCHW", "OIHW", "NCHW"))
        h = h + b3[0][None, :, None, None]
        outs.append(bn(jnp.maximum(h, 0.0), g3[0], be3[0]))
    out = jnp.concatenate(outs, axis=1)
    return out, out


# ----------------------------------- main ----------------------------------- #

if __name__ == "__main__":
    N, Cin, H, W = 2, 4, 16, 16
    n1 = n3 = n5 = n7 = 8

    params = make_params(Cin, n1, n3, n5, n7)
    x = jax.random.normal(jax.random.PRNGKey(0), (N, Cin, H, W), dtype=jnp.float32)

    # tile_rows=128 -> 4 grid tiles: exercises the halo windows and the exact
    # cross-tile BatchNorm merge even at this toy resolution (auto-sizing picks
    # bigger tiles for real resolutions).
    res, out = dilated_inception_forward(x, params, tile_rows=128)
    jax.block_until_ready((res, out))

    assert res.shape == (N, n1 + n3 + n5 + n7, H, W)
    assert out.shape == (N, n1 + n3 + n5 + n7, H, W)

    ref_res, ref_out = ref_forward(x, params)
    # tolerance: the branch 3x3 matmul uses bf16 operands (f32 accumulation);
    # BN statistics, scale/shift and the 1x1 stems are exact f32.
    err = float(jnp.max(jnp.abs(out - ref_out)))
    assert jnp.allclose(out, ref_out, atol=5e-2, rtol=5e-2), err
    assert jnp.allclose(res, ref_res, atol=5e-2, rtol=5e-2), err

    print("KERNEL_OK")
</pallas_src>

<mosaic_0001>
module attributes {stable_mosaic.version = 11 : i64} {
  func.func @kernel(%arg0: i32, %arg1: memref<128x4xf32, #tpu.memory_space<vmem>>, %arg2: memref<4x32xf32, #tpu.memory_space<vmem>>, %arg3: memref<1x32xf32, #tpu.memory_space<vmem>>, %arg4: memref<1x2x32xf32, #tpu.memory_space<vmem>>) attributes {dimension_semantics = [#tpu.dimension_semantics<parallel>], iteration_bounds = array<i64: 4>, scalar_prefetch = 0 : i64, scratch_operands = 0 : i64, tpu.core_type = #tpu.core_type<tc>, window_params = [{transform_indices = @transform_0, window_bounds = array<i64: 128, 4>}, {pipeline_mode = #tpu.pipeline_mode<synchronous>, transform_indices = @transform_1, window_bounds = array<i64: 4, 32>}, {pipeline_mode = #tpu.pipeline_mode<synchronous>, transform_indices = @transform_2, window_bounds = array<i64: 1, 32>}, {transform_indices = @transform_3, window_bounds = array<i64: 1, 2, 32>}]} {
    %c0 = arith.constant 0 : index
    %c0_0 = arith.constant 0 : index
    %0 = vector.load %arg1[%c0, %c0_0] : memref<128x4xf32, #tpu.memory_space<vmem>>, vector<128x4xf32>
    %c0_1 = arith.constant 0 : index
    %c0_2 = arith.constant 0 : index
    %1 = vector.load %arg2[%c0_1, %c0_2] : memref<4x32xf32, #tpu.memory_space<vmem>>, vector<4x32xf32>
    %cst = arith.constant dense<0.000000e+00> : vector<128x32xf32>
    %2 = tpu.matmul %0, %1, %cst {dimension_numbers = #tpu.dot_dimension_numbers<[1], [0], [0], [1], [0, 0, 1, 1], [], []>} : vector<128x4xf32>, vector<4x32xf32>, vector<128x32xf32> -> vector<128x32xf32>
    %c0_3 = arith.constant 0 : index
    %c0_4 = arith.constant 0 : index
    %3 = vector.load %arg3[%c0_3, %c0_4] : memref<1x32xf32, #tpu.memory_space<vmem>>, vector<1x32xf32>
    %4 = vector.broadcast %3 : vector<1x32xf32> to vector<128x32xf32>
    %5 = arith.addf %2, %4 : vector<128x32xf32>
    %cst_5 = arith.constant 0.000000e+00 : f32
    %6 = vector.broadcast %cst_5 : f32 to vector<128x32xf32>
    %7 = arith.maximumf %5, %6 : vector<128x32xf32>
    %cst_6 = arith.constant dense<0.000000e+00> : vector<32xf32>
    %8 = vector.multi_reduction <add>, %7, %cst_6 [0] : vector<128x32xf32> to vector<32xf32>
    %9 = vector.shape_cast %8 : vector<32xf32> to vector<1x32xf32>
    %cst_7 = arith.constant 7.812500e-03 : f32
    %10 = vector.broadcast %cst_7 : f32 to vector<1x32xf32>
    %11 = arith.mulf %9, %10 : vector<1x32xf32>
    %12 = vector.broadcast %11 : vector<1x32xf32> to vector<128x32xf32>
    %13 = arith.subf %7, %12 : vector<128x32xf32>
    %14 = arith.mulf %13, %13 : vector<128x32xf32>
    %cst_8 = arith.constant dense<0.000000e+00> : vector<32xf32>
    %15 = vector.multi_reduction <add>, %14, %cst_8 [0] : vector<128x32xf32> to vector<32xf32>
    %16 = vector.shape_cast %15 : vector<32xf32> to vector<1x32xf32>
    %17 = tpu.concatenate %9, %16 in 0 : vector<1x32xf32>, vector<1x32xf32> -> vector<2x32xf32>
    %18 = vector.shape_cast %17 : vector<2x32xf32> to vector<1x2x32xf32>
    %c0_9 = arith.constant 0 : index
    %c0_10 = arith.constant 0 : index
    %c0_11 = arith.constant 0 : index
    %19 = vector.load %arg4[%c0_9, %c0_10, %c0_11] : memref<1x2x32xf32, #tpu.memory_space<vmem>>, vector<1x2x32xf32>
    tpu.vector_store %arg4[%c0_9, %c0_10, %c0_11], %18 {strides = array<i32>} : memref<1x2x32xf32, #tpu.memory_space<vmem>>, vector<1x2x32xf32>,
    return
  }
  func.func @transform_0(%arg0: i32) -> (i32, i32) {
    %c0_i32 = arith.constant 0 : i32
    %c0_i32_0 = arith.constant 0 : i32
    return %arg0, %c0_i32 : i32, i32
  }
  func.func @transform_1(%arg0: i32) -> (i32, i32) {
    %c0_i32 = arith.constant 0 : i32
    %c0_i32_0 = arith.constant 0 : i32
    %c0_i32_1 = arith.constant 0 : i32
    return %c0_i32, %c0_i32_0 : i32, i32
  }
  func.func @transform_2(%arg0: i32) -> (i32, i32) {
    %c0_i32 = arith.constant 0 : i32
    %c0_i32_0 = arith.constant 0 : i32
    %c0_i32_1 = arith.constant 0 : i32
    return %c0_i32, %c0_i32_0 : i32, i32
  }
  func.func @transform_3(%arg0: i32) -> (i32, i32, i32) {
    %c0_i32 = arith.constant 0 : i32
    %c0_i32_0 = arith.constant 0 : i32
    %c0_i32_1 = arith.constant 0 : i32
    return %arg0, %c0_i32, %c0_i32_0 : i32, i32, i32
  }
}

</mosaic_0001>

<bundles_post_ra>
// kernel: tpu_custom_call.1
= control target key start
LH: loop header
LB: loop body
LE: loop exit
PB: predicated region body
PF: predicated region fallthrough
CT: control target
= control target key end

     0   :  { %8 = vsyncpa [#allocation3], 0  ;;  %s1038_s0 = inlined_call_operand.vmem [shape: f32[512,4], index: 0, kind: input, shape index: {}]   ;;  %s1039_s1 = inlined_call_operand.vmem [shape: f32[4,32], index: 1, kind: input, shape index: {}]   ;;  %s1040_s2 = inlined_call_operand.vmem [shape: f32[1,32], index: 2, kind: input, shape index: {}]   ;;  %s1041_s3 = inlined_call_operand.hbm [shape: f32[4,2,32], index: 3, kind: output, shape index: {}]  }
   0x1   :  { %10 = vsyncpa [#allocation3 + $0x1], 0  ;;  %s790_s12 = smov 0   ;;  %s792_s13 = smov 0  }
   0x2   :  { %s794_s14 = smov 0   ;;  %s796_s15 = smov 0  }
   0x3 LB: > { %s811_s16 = sadd.s32 4294967295, %s767_s15   ;;  %s594_s17 = sadd.s32 4294967294, %s767_s15   ;;  %s767_s15 = sphi %s796_s15, %s1047_s15   ;;  %s763_s14 = sphi %s794_s14, %s1046_s14   ;;  %s759_s13 = sphi %s792_s13, %s1045_s13   ;;  %s755_s12 = sphi %s790_s12, %s1044_s12  }
   0x4   : > { %s815_s18 = sadd.s32 1, %s767_s15   ;;  %s91_s19 = sadd.s32 1, %s763_s14 }
   0x5   : > { %s88_s20 = ssub.s32 %s767_s15, %s815_s18  ;;  %p101_p0 = scmp.ne.s32.totalorder %s763_s14, %s759_s13 }
   0x6   : > { %p89_p1 = scmp.eq.s32.totalorder %s88_s20, 0  ;;  %p102_p2 = scmp.eq.s32.totalorder %s811_s16, 3 }
   0x7   : > { %p107_p3 = scmp.ne.s32.totalorder %s759_s13, %s755_s12  ;;  %p108_p4 = scmp.eq.s32.totalorder %s594_s17, 3 }
   0x8   : > { %s826_s21 = scalar_select %p89_p1, %s763_s14, %s91_s19  }
   0x9   : > { %p828_p5 = por %p102_p2, %p101_p0  ;;  %p832_p6 = por %p108_p4, %p107_p3 }
   0xa   : > { %p597_p7 = scmp.ge.s32.totalorder %s767_s15, 1  ;;  %p141_p8 = scmp.lt.s32.totalorder %s767_s15, 5 }
   0xc   : > { %p142_p9 = pnand %p597_p7, %p141_p8 }
   0xd   : > { %s599_s26 = sshll.u32 (!%p142_p9), %s811_s16, 4  ;;  %s162_s6 = sand.u32 (!%p142_p9), 1, %s759_s13  }
   0xe   : > { %145 = sbr.rel (%p142_p9) target bundleno = 331 (0x14b), region = 32  ;;  %p166_p10 = scmp.lt.s32.totalorder (!%p142_p9), %s599_s26, 63 }
   0xf   : > { %s598_s7 = sshll.u32 (!%p142_p9), %s162_s6, 1  ;;  %s620_s8 = sshll.u32 (!%p142_p9), %s811_s16, 5 }
  0x10   : > { %s164_s9 = scalar_lea.vmem (!%p142_p9), [#allocation2], %s598_s7  ;;  %s1002_s19 = scalar_lea.hbm (!%p142_p9), %s1041_s3, %s620_s8 }
  0x11   : > { %s535_s10 = sshll.u32 (!%p142_p9), %s164_s9, 4  ;;  %s522_s20 = scalar_lea.sflag (!%p142_p9), [#allocation3], %s162_s6  ;;  %s536_s10 = int_to_ptr.vmem [resolvable:$true] %s535_s10 }
  0x12   : > { %s707_s24 = scalar_lea.vmem (!%p142_p9), %s536_s10, 32  ;;  %s769_s16 = smov (!%p142_p9), [#allocation2]  }
  0x13   : > { %v187_v0 = vld [vmem:[%s1039_s1] sm:$0xf]  ;;  %vm244_vm0 = vcmask 1043456   ;;  %s1049_s26 = smov (!%p166_p10, %s599_s26), 63  ;;  %vm195_vm1 = vcmask 31744   ;;  %vm409_vm2 = vcmask 261120   ;;  %p708_p11 = scmp.ne.s32.totalorder %s536_s10, %s707_s24 }
  0x14   : > { %640 = vmatprep.subr.msk.mxu0 %vm244_vm0, %v187_v0  ;;  %666 = vmatprep.subr.msk.mxu1 %vm244_vm0, %v187_v0  ;;  %s600_s27 = sshll.u32 %s1049_s26, 3  ;;  %v864_v17 = vld [vmem:[%s1040_s2] ss:$0 sm:$0xff]  ;;  %vm517_vm3 = vcmask 1040384   ;;  %vm519_vm4 = vcmask 254976   ;;  %s711_s25 = sshll.u32 %s769_s16, 4  ;;  %s712_s25 = int_to_ptr.vmem [resolvable:$false] %s711_s25 }
  0x15   : > { %641 = vmatpush3.msk.msra.mxu0 %vm244_vm0, %v187_v0  ;;  %667 = vmatpush3.msk.msra.mxu1 %vm244_vm0, %v187_v0  ;;  %s169_s30 = scalar_lea.vmem %s1038_s0, %s600_s27  ;;  %p709_p12 = pnand %p708_p11, %p828_p5 }
  0x16   : > { %v171_v1 = vld [vmem:[%s169_s30] sm:$0xff]  ;;  %v172_v2 = vld [vmem:[%s169_s30 + $0x8] sm:$0xff]  ;;  %v173_v3 = vld [vmem:[%s169_s30 + $0x10] sm:$0xff]  ;;  %s713_s26 = scalar_lea.vmem %s712_s25, 64  ;;  %p714_p0 = scmp.lt.s32.totalorder %s536_s10, %s712_s25 }
  0x17   : > { %642 = vmatprep.mubr.msk.f32.mxu0 %vm195_vm1, %v171_v1  ;;  %v179_v4 = vld [vmem:[%s169_s30 + $0x40] sm:$0xff]  ;;  %v174_v5 = vld [vmem:[%s169_s30 + $0x18] sm:$0xff]  ;;  %v180_v6 = vld [vmem:[%s169_s30 + $0x48] sm:$0xff]  ;;  %p710_p13 = pneg %p709_p12  ;;  %p715_p1 = scmp.lt.s32.totalorder %s713_s26, %s707_s24 }
  0x18   : > { %643 = vmatmul.mubr.msk.f32.vlgmr.msra.gmra.mxu0 %vm195_vm1, %v172_v2  ;;  %654 = vmatprep.mubr.msk.f32.mxu1 %vm195_vm1, %v179_v4  ;;  %v181_v7 = vld [vmem:[%s169_s30 + $0x50] sm:$0xff]  ;;  %v175_v8 = vld [vmem:[%s169_s30 + $0x20] sm:$0xff]  ;;  %v182_v9 = vld [vmem:[%s169_s30 + $0x58] sm:$0xff] }
  0x19   : > { %645 = vmatprep.mubr.msk.f32.mxu0 %vm195_vm1, %v173_v3  ;;  %655 = vmatmul.mubr.msk.f32.vlgmr.msra.gmra.mxu1 %vm195_vm1, %v180_v6  ;;  %v183_v10 = vld [vmem:[%s169_s30 + $0x60] sm:$0xff]  ;;  %v176_v11 = vld [vmem:[%s169_s30 + $0x28] sm:$0xff]  ;;  %v177_v12 = vld [vmem:[%s169_s30 + $0x30] sm:$0xff]  ;;  %p716_p2 = por %p715_p1, %p714_p0 }
  0x1a   : > { %657 = vmatprep.mubr.msk.f32.mxu1 %vm195_vm1, %v181_v7  ;;  %v184_v13 = vld [vmem:[%s169_s30 + $0x68] sm:$0xff]  ;;  %v185_v14 = vld [vmem:[%s169_s30 + $0x70] sm:$0xff]  ;;  %v178_v15 = vld [vmem:[%s169_s30 + $0x38] sm:$0xff] }
  0x1b   : > { %v186_v16 = vld [vmem:[%s169_s30 + $0x78] sm:$0xff]  ;;  %p717_p3 = pnand %p716_p2, %p710_p13 }
  0x1c   : > { %646 = vmatmul.mubr.msk.f32.gmra.mxu0 %vm195_vm1, %v174_v5 }
  0x1d   : > { %648 = vmatprep.mubr.msk.f32.mxu0 %vm195_vm1, %v175_v8  ;;  %658 = vmatmul.mubr.msk.f32.gmra.mxu1 %vm195_vm1, %v182_v9 }
  0x1e   : > { %660 = vmatprep.mubr.msk.f32.mxu1 %vm195_vm1, %v183_v10 }
  0x20   : > { %649 = vmatmul.mubr.msk.f32.gmra.mxu0 %vm195_vm1, %v176_v11 }
  0x21   : > { %651 = vmatprep.mubr.msk.f32.mxu0 %vm195_vm1, %v177_v12  ;;  %661 = vmatmul.mubr.msk.f32.gmra.mxu1 %vm195_vm1, %v184_v13 }
  0x22   : > { %663 = vmatprep.mubr.msk.f32.mxu1 %vm195_vm1, %v185_v14 }
  0x24   : > { %652 = vmatmul.mubr.msk.f32.gmra.mxu0 %vm195_vm1, %v178_v15 }
  0x25   : > { %664 = vmatmul.mubr.msk.f32.gmra.mxu1 %vm195_vm1, %v186_v16 }
  0xd8   : > { %v644_v18 = vpop.f32.mrf.mxu0 }
  0xd9   : > { %v867_v19 = vadd.f32 %v644_v18, %v864_v17  ;;  %v656_v21 = vpop.f32.mrf.mxu1 }
  0xda   : > { %v314_v20 = vpop.f32.mrf.mxu0  ;;  %v920_v59 = vadd.f32 %v656_v21, %v864_v17 }
  0xdb   : > { %v870_v22 = vadd.f32 %v864_v17, %v314_v20  ;;  %v354_v24 = vpop.f32.mrf.mxu1  ;;  %v394_v25 = vmax.f32 %v867_v19, 0.0 }
  0xdc   : > { %v647_v23 = vpop.f32.mrf.mxu0  ;;  %v912_v53 = vadd.f32 %v864_v17, %v354_v24  ;;  %v402_v3 = vmax.f32 %v920_v59, 0.0 }
  0xdd   : > { %v393_v26 = vmax.f32 %v870_v22, 0.0  ;;  %v875_v27 = vadd.f32 %v647_v23, %v864_v17  ;;  %v659_v29 = vpop.f32.mrf.mxu1  ;;  %v411_v34 = vsel %vm409_vm2, %v394_v25, 0.0 }
  0xde   : > { %v324_v28 = vpop.f32.mrf.mxu0  ;;  %v401_v62 = vmax.f32 %v912_v53, 0.0  ;;  %v932_v4 = vadd.f32 %v659_v29, %v864_v17  ;;  %v427_v11 = vsel %vm409_vm2, %v402_v3, 0.0 }
  0xdf   : > { %v410_v30 = vsel %vm409_vm2, %v393_v26, 0.0  ;;  %v881_v31 = vadd.f32 %v864_v17, %v324_v28  ;;  %v364_v33 = vpop.f32.mrf.mxu1  ;;  %v396_v35 = vmax.f32 %v875_v27, 0.0 }
  0xe0   : > { %v650_v32 = vpop.f32.mrf.mxu0  ;;  %v412_v38 = vadd.f32 %v411_v34, %v410_v30  ;;  %v925_v63 = vadd.f32 %v864_v17, %v364_v33  ;;  %v425_v6 = vsel %vm409_vm2, %v401_v62, 0.0  ;;  %v404_v12 = vmax.f32 %v932_v4, 0.0 }
  0xe1   : > { %v395_v36 = vmax.f32 %v881_v31, 0.0  ;;  %v889_v37 = vadd.f32 %v650_v32, %v864_v17  ;;  %v662_v44 = vpop.f32.mrf.mxu1  ;;  %v415_v45 = vsel %vm409_vm2, %v396_v35, 0.0 }
  0xe2   : > { %v334_v39 = vpop.f32.mrf.mxu0  ;;  %v403_v7 = vmax.f32 %v925_v63, 0.0  ;;  %v944_v13 = vadd.f32 %v662_v44, %v864_v17  ;;  %v431_v21 = vsel %vm409_vm2, %v404_v12, 0.0 }
  0xe3   : > { %v413_v40 = vsel %vm409_vm2, %v395_v36, 0.0  ;;  %v895_v41 = vadd.f32 %v864_v17, %v334_v39  ;;  %v398_v46 = vmax.f32 %v889_v37, 0.0  ;;  %v374_v55 = vpop.f32.mrf.mxu1 }
  0xe4   : > { %v414_v42 = vadd.f32 %v413_v40, %v412_v38  ;;  %v653_v43 = vpop.f32.mrf.mxu0  ;;  %v939_v8 = vadd.f32 %v864_v17, %v374_v55  ;;  %v429_v15 = vsel %vm409_vm2, %v403_v7, 0.0  ;;  %v406_v23 = vmax.f32 %v944_v13, 0.0 }
  0xe5   : > { %v397_v47 = vmax.f32 %v895_v41, 0.0  ;;  %v903_v48 = vadd.f32 %v653_v43, %v864_v17  ;;  %v419_v56 = vsel %vm409_vm2, %v398_v46, 0.0  ;;  %v665_v1 = vpop.f32.mrf.mxu1 }
  0xe6   : > { %v416_v49 = vadd.f32 %v415_v45, %v414_v42  ;;  %v344_v50 = vpop.f32.mrf.mxu0  ;;  %v405_v16 = vmax.f32 %v939_v8, 0.0  ;;  %v954_v24 = vadd.f32 %v665_v1, %v864_v17  ;;  %v435_v33 = vsel %vm409_vm2, %v406_v23, 0.0 }
  0xe7   : > { %v417_v51 = vsel %vm409_vm2, %v397_v47, 0.0  ;;  %v909_v52 = vadd.f32 %v864_v17, %v344_v50  ;;  %v400_v57 = vmax.f32 %v903_v48, 0.0  ;;  %v384_v10 = vpop.f32.mrf.mxu1 }
  0xe8   : > { %v418_v54 = vadd.f32 %v417_v51, %v416_v49  ;;  %v949_v18 = vadd.f32 %v864_v17, %v384_v10  ;;  %v433_v29 = vsel %vm409_vm2, %v405_v16, 0.0  ;;  %v408_v34 = vmax.f32 %v954_v24, 0.0 }
  0xe9   : > { %v399_v58 = vmax.f32 %v909_v52, 0.0  ;;  %v423_v2 = vsel %vm409_vm2, %v400_v57, 0.0 }
  0xea   : > { %v420_v60 = vadd.f32 %v419_v56, %v418_v54  ;;  %v407_v30 = vmax.f32 %v949_v18, 0.0  ;;  %v439_v42 = vsel %vm409_vm2, %v408_v34, 0.0 }
  0xeb   : > { %v421_v61 = vsel %vm409_vm2, %v399_v58, 0.0 }
  0xec   : > { %v422_v0 = vadd.f32 %v421_v61, %v420_v60  ;;  %v437_v39 = vsel %vm409_vm2, %v407_v30, 0.0 }
  0xee   : > { %v424_v5 = vadd.f32 %v423_v2, %v422_v0 }
  0xf0   : > { %v426_v9 = vadd.f32 %v425_v6, %v424_v5 }
  0xf2   : > { %v428_v14 = vadd.f32 %v427_v11, %v426_v9 }
  0xf4   : > { %v430_v20 = vadd.f32 %v429_v15, %v428_v14 }
  0xf6   : > { %v432_v28 = vadd.f32 %v431_v21, %v430_v20 }
  0xf8   : > { %v434_v32 = vadd.f32 %v433_v29, %v432_v28 }
  0xfa   : > { %v436_v38 = vadd.f32 %v435_v33, %v434_v32 }
  0xfc   : > { %v438_v40 = vadd.f32 %v437_v39, %v436_v38 }
  0xfe   : > { %v440_v43 = vadd.f32 %v439_v42, %v438_v40 }
 0x100   : > { %v441_v44 = vrot.slane %v440_v43, 4 }
 0x102   : > { %v442_v17 = vadd.f32 %v441_v44, %v440_v43 }
 0x104   : > { %v443_v45 = vrot.slane %v442_v17, 2 }
 0x106   : > { %v444_v49 = vadd.f32 %v443_v45, %v442_v17 }
 0x108   : > { %v445_v50 = vrot.slane %v444_v49, 1 }
 0x10a   : > { %v962_v51 = vadd.f32 %v445_v50, %v444_v49 }
 0x10c   : > { %v447_v52 = vmul.f32 0.0078125, %v962_v51 }
 0x10e   : > { %v448_v54 = vsub.f32 %v393_v26, %v447_v52  ;;  %v449_v55 = vsub.f32 %v394_v25, %v447_v52  ;;  %v450_v56 = vsub.f32 %v395_v36, %v447_v52  ;;  %v451_v59 = vsub.f32 %v396_v35, %v447_v52 }
 0x10f   : > { %v452_v63 = vsub.f32 %v397_v47, %v447_v52  ;;  %v453_v1 = vsub.f32 %v398_v46, %v447_v52  ;;  %v454_v31 = vsub.f32 %v399_v58, %v447_v52  ;;  %v455_v2 = vsub.f32 %v400_v57, %v447_v52 }
 0x110   : > { %v464_v60 = vmul.f32 %v448_v54, %v448_v54  ;;  %v465_v61 = vmul.f32 %v449_v55, %v449_v55  ;;  %v466_v0 = vmul.f32 %v450_v56, %v450_v56  ;;  %v467_v22 = vmul.f32 %v451_v59, %v451_v59 }
 0x111   : > { %v468_v36 = vmul.f32 %v452_v63, %v452_v63  ;;  %v469_v41 = vmul.f32 %v453_v1, %v453_v1  ;;  %v456_v37 = vsub.f32 %v401_v62, %v447_v52  ;;  %v470_v46 = vmul.f32 %v454_v31, %v454_v31 }
 0x112   : > { %v480_v26 = vsel %vm409_vm2, %v464_v60, 0.0  ;;  %v481_v19 = vsel %vm409_vm2, %v465_v61, 0.0  ;;  %v483_v27 = vsel %vm409_vm2, %v466_v0, 0.0  ;;  %v485_v47 = vsel %vm409_vm2, %v467_v22, 0.0 }
 0x113   : > { %v482_v25 = vadd.f32 %v481_v19, %v480_v26  ;;  %v487_v5 = vsel %vm409_vm2, %v468_v36, 0.0  ;;  %v457_v8 = vsub.f32 %v402_v3, %v447_v52  ;;  %v471_v58 = vmul.f32 %v455_v2, %v455_v2 }
 0x114   : > { %v489_v9 = vsel %vm409_vm2, %v469_v41, 0.0  ;;  %v458_v11 = vsub.f32 %v403_v7, %v447_v52  ;;  %v472_v13 = vmul.f32 %v456_v37, %v456_v37  ;;  %v491_v48 = vsel %vm409_vm2, %v470_v46, 0.0 }
 0x115   : > { %v484_v35 = vadd.f32 %v483_v27, %v482_v25  ;;  %v459_v14 = vsub.f32 %v404_v12, %v447_v52  ;;  %v473_v15 = vmul.f32 %v457_v8, %v457_v8  ;;  %v493_v18 = vsel %vm409_vm2, %v471_v58, 0.0 }
 0x116   : > { %v460_v62 = vsub.f32 %v405_v16, %v447_v52  ;;  %v474_v20 = vmul.f32 %v458_v11, %v458_v11  ;;  %v495_v21 = vsel %vm409_vm2, %v472_v13, 0.0  ;;  %v461_v3 = vsub.f32 %v406_v23, %v447_v52 }
 0x117   : > { %v486_v4 = vadd.f32 %v485_v47, %v484_v35  ;;  %v475_v28 = vmul.f32 %v459_v14, %v459_v14  ;;  %v497_v29 = vsel %vm409_vm2, %v473_v15, 0.0  ;;  %v462_v7 = vsub.f32 %v407_v30, %v447_v52 }
 0x118   : > { %v476_v33 = vmul.f32 %v460_v62, %v460_v62  ;;  %v499_v38 = vsel %vm409_vm2, %v474_v20, 0.0  ;;  %v463_v39 = vsub.f32 %v408_v34, %v447_v52  ;;  %v477_v40 = vmul.f32 %v461_v3, %v461_v3 }
 0x119   : > { %v488_v6 = vadd.f32 %v487_v5, %v486_v4  ;;  %v501_v42 = vsel %vm409_vm2, %v475_v28, 0.0  ;;  %v478_v43 = vmul.f32 %v462_v7, %v462_v7 }
 0x11a   : > { %v503_v44 = vsel %vm409_vm2, %v476_v33, 0.0  ;;  %v479_v17 = vmul.f32 %v463_v39, %v463_v39  ;;  %v505_v45 = vsel %vm409_vm2, %v477_v40, 0.0 }
 0x11b   : > { %v490_v10 = vadd.f32 %v489_v9, %v488_v6  ;;  %v507_v30 = vsel %vm409_vm2, %v478_v43, 0.0 }
 0x11c   : > { %v509_v54 = vsel %vm409_vm2, %v479_v17, 0.0 }
 0x11d   : > { %v492_v57 = vadd.f32 %v491_v48, %v490_v10 }
 0x11f   : > { %v494_v53 = vadd.f32 %v493_v18, %v492_v57 }
 0x121   : > { %v496_v24 = vadd.f32 %v495_v21, %v494_v53 }
 0x123   : > { %v498_v32 = vadd.f32 %v497_v29, %v496_v24 }
 0x125   : > { %v500_v12 = vadd.f32 %v499_v38, %v498_v32 }
 0x127   : > { %v502_v16 = vadd.f32 %v501_v42, %v500_v12 }
 0x129   : > { %v504_v23 = vadd.f32 %v503_v44, %v502_v16 }
 0x12b   : > { %v506_v49 = vadd.f32 %v505_v45, %v504_v23 }
 0x12d   : > { %v508_v50 = vadd.f32 %v507_v30, %v506_v49 }
 0x12f   : > { %v510_v55 = vadd.f32 %v509_v54, %v508_v50 }
 0x131   : > { %v511_v34 = vrot.slane %v510_v55, 4 }
 0x133   : > { %v512_v52 = vadd.f32 %v511_v34, %v510_v55 }
 0x135   : > { %v513_v56 = vrot.slane %v512_v52, 2 }
 0x137   : > { %v514_v59 = vadd.f32 %v513_v56, %v512_v52 }
 0x139   : > { %v515_v60 = vrot.slane %v514_v59, 1 }
 0x13b   : > { %v516_v61 = vadd.f32 %v515_v60, %v514_v59 }
 0x13d   : > { %v518_v63 = vsel %vm517_vm3, %v962_v51, %v516_v61 }
 0x13e   : > { %520 = vst.msk [vmem:[%s164_s9] sm:$0x3] %vm519_vm4, %v518_v63 }
 0x13f   : > { %720 = shalt.err (!%p717_p3)
}
 0x140   : > { %s721_s27 = scalar_lea.hbm %s1002_s19, 32  ;;  %s725_s30 = scalar_lea.hbm %s1041_s3, 128 }
 0x141   : > { %p722_p4 = scmp.ne.s32.totalorder %s1002_s19, %s721_s27  ;;  %p726_p9 = scmp.lt.s32.totalorder %s1002_s19, %s1041_s3 }
 0x142   : > { %p727_p10 = scmp.lt.s32.totalorder %s725_s30, %s721_s27 }
 0x143   : > { %p723_p7 = pnand %p722_p4, %p828_p5 }
 0x144   : > { %p728_p11 = por %p727_p10, %p726_p9 }
 0x145   : > { %p724_p8 = pneg %p723_p7 }
 0x147   : > { %p729_p12 = pnand %p728_p11, %p724_p8 }
 0x149   : > { %732 = shalt.err (!%p729_p12)
}
 0x14a   : > { %668 = dma.vmem_to_hbm [thread:$0]  (%p828_p5), %s536_s10, 32, %s1002_s19, %s522_s20  }
 0x14b PF: > { %p674_p13 = scmp.ge.s32.totalorder %s767_s15, 2  ;;  %s547_s6 = sand.u32 1, %s755_s12  }
 0x14c   : > { %s548_s7 = scalar_lea.sflag [#allocation3], %s547_s6 }
 0x14d   : > { %p671_p0 = pnand %p674_p13, %p832_p6 }
 0x14f   : > { %p672_p1 = pneg %p671_p0 }
 0x151   : > { %750 = dma.done.wait (%p672_p1), %s548_s7, 32  }
 0x152   : > { %752 = vsyncadd (%p672_p1), %s548_s7, 4294967264  ;;  %p13_p2 = scmp.ge.s32.totalorder %s815_s18, 6   ;;  %s1044_s12 = smov %s759_s13 }
 0x153   : > { %s1045_s13 = smov %s763_s14  ;;  %s1046_s14 = smov %s826_s21 }
 0x154   : > { %s1047_s15 = smov %s815_s18  ;;  %15 = sbr.rel (!%p13_p2) target bundleno = 3 (0x3), region = 67 }
 0x159   :  { %553 = vsyncpa [#allocation3], 1 }
 0x15a   :  { %555 = vsyncpa [#allocation3 + $0x1], 1 }

</bundles_post_ra>
